<compile_context>
chip_gen: v6e
topology: v6e:2x2x1
jax: 0.10.0
libtpu: 0.0.40
codegen_flags: <defaults>
</compile_context>

<pallas_src>
import functools

import jax
import jax.numpy as jnp
from jax.experimental import pallas as pl
from jax.experimental.pallas import tpu as pltpu


def _conv1x1x1_sum_kernel(w_ref, b_ref, x_ref, o_ref, *, cin):
    """x_ref: (TN, C, TS) VMEM tile; w_ref: (C,) SMEM; b_ref: (1,) SMEM."""
    # Per-channel slices keep vreg pressure at one (TN, TS) slab per term.
    acc = x_ref[:, 0, :].astype(jnp.float32) * w_ref[0] + b_ref[0]
    for c in range(1, cin):                       # static unroll, C is tiny
        acc = acc + x_ref[:, c, :].astype(jnp.float32) * w_ref[c]
    o_ref[...] = acc.astype(o_ref.dtype)


def _round_up(v, m):
    return ((v + m - 1) // m) * m


def _pick_batch_tile(n):
    """Tile batch only when it is large; keeps per-block VMEM bounded and
    output stores sublane-dense as N scales (no-op for small demo N)."""
    if n > 8 and n % 8 == 0:
        return 8
    return n


def _pick_spatial_tile(s_pad, tn, c, itemsize, *, target_bytes=4 << 20):
    """Largest multiple-of-128 tile dividing s_pad such that the x block
    (tn * pad8(c) * ts * itemsize, the VMEM footprint incl. sublane padding)
    stays within ~target_bytes, while keeping >=2 grid steps along S so the
    v7x megacore has work to shard across both TensorCores.  Double-buffered
    this stays well inside the default scoped VMEM (16 MiB v5e / 32 MiB
    v6e & v7x)."""
    c_pad = _round_up(max(c, 1), 8)
    min_steps = 2 if s_pad >= 256 else 1
    ts_cap = (target_bytes // (tn * c_pad * itemsize)) // 128 * 128
    ts_cap = min(max(ts_cap, 128), (s_pad // min_steps) // 128 * 128)
    ts_cap = max(ts_cap, 128)
    ts = ts_cap
    while ts >= 128:
        if s_pad % ts == 0:
            return ts
        ts -= 128
    return 128


def ensemble_net_forward(w, b, x):
    """w: [1, C, 1, 1, 1] (PyTorch Conv3d weight), b: [1], x: [N, C, D, H, W].

    Returns [N, D, H, W] == Conv3d(C, 1, kernel=1, stride=1)(x).sum(dim=1).
    """
    n, c, d, h, wd = x.shape
    s = d * h * wd
    s_pad = _round_up(s, 128)

    x2 = x.reshape(n, c, s)
    if s_pad != s:
        # Lane-dense output width: pad S up to a multiple of 128, slice after.
        x2 = jnp.pad(x2, ((0, 0), (0, 0), (0, s_pad - s)))

    w_vec = w.reshape(c).astype(jnp.float32)
    b_vec = b.reshape(1).astype(jnp.float32)

    itemsize = jnp.dtype(x.dtype).itemsize
    tn = _pick_batch_tile(n)
    ts = _pick_spatial_tile(s_pad, tn, c, itemsize)
    grid = (n // tn, s_pad // ts)

    kernel = functools.partial(_conv1x1x1_sum_kernel, cin=c)
    out = pl.pallas_call(
        kernel,
        out_shape=jax.ShapeDtypeStruct((n, s_pad), x.dtype),
        grid_spec=pltpu.PrefetchScalarGridSpec(
            num_scalar_prefetch=2,                 # w_vec, b_vec -> SMEM
            grid=grid,
            in_specs=[
                pl.BlockSpec((tn, c, ts), lambda bi, si, w_s, b_s: (bi, 0, si)),
            ],
            out_specs=pl.BlockSpec((tn, ts), lambda bi, si, w_s, b_s: (bi, si)),
        ),
        compiler_params=pltpu.CompilerParams(
            dimension_semantics=("parallel", "parallel"),
        ),
        cost_estimate=pl.CostEstimate(
            flops=2 * n * c * s,
            transcendentals=0,
            bytes_accessed=(n * c * s + n * s) * itemsize + (c + 1) * 4,
        ),
    )(w_vec, b_vec, x2)

    if s_pad != s:
        out = out[:, :s]
    return out.reshape(n, d, h, wd)


if __name__ == "__main__":
    key = jax.random.PRNGKey(0)
    kw, kb, kx = jax.random.split(key, 3)

    inputs = 4                                    # EnsembleNet(inputs=4)
    N, D, H, W = 2, 8, 16, 16                     # small NCDHW input

    bound = 1.0 / (inputs ** 0.5)                 # nn.Conv3d default init bound
    w = jax.random.uniform(kw, (1, inputs, 1, 1, 1), jnp.float32, -bound, bound)
    b = jax.random.uniform(kb, (1,), jnp.float32, -bound, bound)
    x = jax.random.normal(kx, (N, inputs, D, H, W), jnp.float32)

    out = jax.jit(ensemble_net_forward)(w, b, x)
    out = jax.block_until_ready(out)

    assert out.shape == (N, D, H, W), out.shape
    ref = jnp.einsum("ncdhw,c->ndhw", x, w.reshape(inputs)) + b[0]
    assert jnp.allclose(out, ref, atol=1e-5, rtol=1e-5)
    assert bool(jnp.all(jnp.isfinite(out)))
    print("KERNEL_OK")
</pallas_src>

<mosaic_0001>
module attributes {stable_mosaic.version = 11 : i64} {
  func.func @_conv1x1x1_sum_kernel(%arg0: i32, %arg1: i32, %arg2: memref<4xf32, #tpu.memory_space<smem>>, %arg3: memref<1xf32, #tpu.memory_space<smem>>, %arg4: memref<2x4x1024xf32, #tpu.memory_space<vmem>>, %arg5: memref<2x1024xf32, #tpu.memory_space<vmem>>) attributes {dimension_semantics = [#tpu.dimension_semantics<parallel>, #tpu.dimension_semantics<parallel>], iteration_bounds = array<i64: 1, 2>, scalar_prefetch = 2 : i64, scratch_operands = 0 : i64, tpu.core_type = #tpu.core_type<tc>, window_params = [{transform_indices = @transform_0, window_bounds = array<i64: 2, 4, 1024>}, {transform_indices = @transform_1, window_bounds = array<i64: 2, 1024>}]} {
    %c0 = arith.constant 0 : index
    %c0_0 = arith.constant 0 : index
    %c0_1 = arith.constant 0 : index
    %0 = vector.load %arg4[%c0, %c0_0, %c0_1] : memref<2x4x1024xf32, #tpu.memory_space<vmem>>, vector<2x1x1024xf32>
    %1 = vector.shape_cast %0 : vector<2x1x1024xf32> to vector<2x1024xf32>
    %c0_2 = arith.constant 0 : index
    %2 = memref.load %arg2[%c0_2] : memref<4xf32, #tpu.memory_space<smem>>
    %3 = vector.broadcast %2 : f32 to vector<2x1024xf32>
    %4 = arith.mulf %1, %3 : vector<2x1024xf32>
    %c0_3 = arith.constant 0 : index
    %5 = memref.load %arg3[%c0_3] : memref<1xf32, #tpu.memory_space<smem>>
    %6 = vector.broadcast %5 : f32 to vector<2x1024xf32>
    %7 = arith.addf %4, %6 : vector<2x1024xf32>
    %c0_4 = arith.constant 0 : index
    %c1 = arith.constant 1 : index
    %c0_5 = arith.constant 0 : index
    %8 = vector.load %arg4[%c0_4, %c1, %c0_5] : memref<2x4x1024xf32, #tpu.memory_space<vmem>>, vector<2x1x1024xf32>
    %9 = vector.shape_cast %8 : vector<2x1x1024xf32> to vector<2x1024xf32>
    %c1_6 = arith.constant 1 : index
    %10 = memref.load %arg2[%c1_6] : memref<4xf32, #tpu.memory_space<smem>>
    %11 = vector.broadcast %10 : f32 to vector<2x1024xf32>
    %12 = arith.mulf %9, %11 : vector<2x1024xf32>
    %13 = arith.addf %7, %12 : vector<2x1024xf32>
    %c0_7 = arith.constant 0 : index
    %c2 = arith.constant 2 : index
    %c0_8 = arith.constant 0 : index
    %14 = vector.load %arg4[%c0_7, %c2, %c0_8] : memref<2x4x1024xf32, #tpu.memory_space<vmem>>, vector<2x1x1024xf32>
    %15 = vector.shape_cast %14 : vector<2x1x1024xf32> to vector<2x1024xf32>
    %c2_9 = arith.constant 2 : index
    %16 = memref.load %arg2[%c2_9] : memref<4xf32, #tpu.memory_space<smem>>
    %17 = vector.broadcast %16 : f32 to vector<2x1024xf32>
    %18 = arith.mulf %15, %17 : vector<2x1024xf32>
    %19 = arith.addf %13, %18 : vector<2x1024xf32>
    %c0_10 = arith.constant 0 : index
    %c3 = arith.constant 3 : index
    %c0_11 = arith.constant 0 : index
    %20 = vector.load %arg4[%c0_10, %c3, %c0_11] : memref<2x4x1024xf32, #tpu.memory_space<vmem>>, vector<2x1x1024xf32>
    %21 = vector.shape_cast %20 : vector<2x1x1024xf32> to vector<2x1024xf32>
    %c3_12 = arith.constant 3 : index
    %22 = memref.load %arg2[%c3_12] : memref<4xf32, #tpu.memory_space<smem>>
    %23 = vector.broadcast %22 : f32 to vector<2x1024xf32>
    %24 = arith.mulf %21, %23 : vector<2x1024xf32>
    %25 = arith.addf %19, %24 : vector<2x1024xf32>
    %c0_13 = arith.constant 0 : index
    %c0_14 = arith.constant 0 : index
    %26 = vector.load %arg5[%c0_13, %c0_14] : memref<2x1024xf32, #tpu.memory_space<vmem>>, vector<2x1024xf32>
    tpu.vector_store %arg5[%c0_13, %c0_14], %25 {strides = array<i32>} : memref<2x1024xf32, #tpu.memory_space<vmem>>, vector<2x1024xf32>,
    return
  }
  func.func @transform_0(%arg0: i32, %arg1: i32, %arg2: memref<4xf32, #tpu.memory_space<smem>>, %arg3: memref<1xf32, #tpu.memory_space<smem>>) -> (i32, i32, i32) {
    %c0_i32 = arith.constant 0 : i32
    %c0_i32_0 = arith.constant 0 : i32
    return %arg0, %c0_i32, %arg1 : i32, i32, i32
  }
  func.func @transform_1(%arg0: i32, %arg1: i32, %arg2: memref<4xf32, #tpu.memory_space<smem>>, %arg3: memref<1xf32, #tpu.memory_space<smem>>) -> (i32, i32) {
    %c0_i32 = arith.constant 0 : i32
    return %arg0, %arg1 : i32, i32
  }
}

</mosaic_0001>

<bundles_post_ra>
// kernel: ensemble_net_forward.1
= control target key start
LH: loop header
LB: loop body
LE: loop exit
PB: predicated region body
PF: predicated region fallthrough
CT: control target
= control target key end

     0   :  { %s562_s0 = inlined_call_operand.vmem [shape: f32[4], index: 0, kind: input, shape index: {}]   ;;  %s563_s1 = inlined_call_operand.<no memory space> [shape: f32[1], index: 1, kind: input, shape index: {}]   ;;  %s564_s2 = inlined_call_operand.vmem [shape: f32[2,4,2048], index: 2, kind: input, shape index: {}]   ;;  %s565_s3 = inlined_call_operand.vmem [shape: f32[2,2048], index: 3, kind: output, shape index: {}]  }
   0x1   :  { %s8_s14 = sshll.u32 %s562_s0, 4  ;;  %12 = sst [smem:[#allocation4]] %s563_s1  ;;  %s9_s14 = int_to_ptr.vmem [resolvable:$true] %s8_s14 }
   0x2   :  { %s410_s17 = scalar_lea.vmem %s9_s14, 16  ;;  %p415_p1 = scmp.lt.s32.totalorder %s9_s14, %s9_s14 }
   0x3   :  { %p411_p0 = scmp.ne.s32.totalorder %s9_s14, %s410_s17  ;;  %p416_p2 = scmp.lt.s32.totalorder %s410_s17, %s410_s17 }
   0x5   :  { %p417_p3 = por %p416_p2, %p415_p1 }
   0x7   :  { %p418_p4 = pnand %p417_p3, %p411_p0 }
   0x9   :  { %421 = shalt.err (!%p418_p4)  }
   0xa   :  { %s464_s18 = smov [#allocation3]  }
   0xb   :  { %11 = dma.vmem_to_smem %s9_s14, 16, %s464_s18, [#allocation2] }
   0xc   :  { %442 = dma.done.wait [#allocation2], 16 }
   0xd   :  { %443 = vsyncadd [#allocation2], 4294967280 }
   0xe   :  { %14 = sfence }
   0xf   :  { %s491_s19 = smov 0   ;;  %s493_s0 = smov 0  }
  0x10   :  { %s495_s20 = smov 0   ;;  %s497_s1 = smov 0  }
  0x11   :  { %s499_s21 = smov 0  }
  0x12 LB: > { %s29_s22 = sadd.s32 1, %s458_s1  ;;  %p48_p6 = scmp.ne.s32.totalorder %s450_s0, %s446_s19  ;;  %s462_s21 = sphi %s499_s21, %s20_s21   ;;  %s458_s1 = sphi %s497_s1, %s570_s1   ;;  %s454_s20 = sphi %s495_s20, %s569_s20   ;;  %s450_s0 = sphi %s493_s0, %s568_s0   ;;  %s446_s19 = sphi %s491_s19, %s567_s19  }
  0x13   : > { %p30_p5 = scmp.ge.s32.totalorder %s29_s22, 2  ;;  %p49_p7 = scmp.eq.s32.totalorder %s462_s21, 0 }
  0x14   : > { %s41_s24 = sadd.s32 1, %s450_s0  ;;  %p346_p10 = scmp.ge.s32.totalorder %s462_s21, 2 }
  0x15   : > { %s572_s22 = smov (%p30_p5, %s29_s22), 0  ;;  %p50_p8 = por %p49_p7, %p48_p6 }
  0x16   : > { %s37_s23 = ssub.s32 %s458_s1, %s572_s22  ;;  %102 = sbr.rel (%p346_p10) target bundleno = 35 (0x23), region = 16 }
  0x17   : > { %p39_p9 = scmp.eq.s32.totalorder %s37_s23, 0 }
  0x19   : > { %s526_s25 = scalar_select %p39_p9, %s450_s0, %s41_s24  }
  0x1b   : > { %105 = sbr.rel (!%p50_p8) target bundleno = 35 (0x23), region = 20  ;;  %s107_s26 = sand.u32 (%p50_p8), 1, %s450_s0  }
  0x1c   : > { %s368_s27 = sshll.u32 (%p50_p8), %s458_s1, 5  ;;  %s347_s28 = sshll.u32 (%p50_p8), %s107_s26, 6 }
  0x1d   : > { %s115_s4 = scalar_lea.vmem (%p50_p8), %s564_s2, %s368_s27  ;;  %s109_s5 = scalar_lea.vmem (%p50_p8), [#allocation5], %s347_s28 }
  0x1e   : > { %v128_v0 = vld [vmem:[%s115_s4] sm:$0xff] (%p50_p8)  ;;  %v130_v1 = vld [vmem:[%s115_s4 + $0x8] sm:$0xff] (%p50_p8)  ;;  %v132_v2 = vld [vmem:[%s115_s4 + $0x10] sm:$0xff] (%p50_p8) }
  0x1f   : > { %129 = vst [vmem:[%s109_s5] sm:$0xff] (%p50_p8), %v128_v0  ;;  %131 = vst [vmem:[%s109_s5 + $0x8] sm:$0xff] (%p50_p8), %v130_v1  ;;  %v134_v3 = vld [vmem:[%s115_s4 + $0x18] sm:$0xff] (%p50_p8)  ;;  %v136_v4 = vld [vmem:[%s115_s4 + $0x40] sm:$0xff] (%p50_p8) }
  0x20   : > { %133 = vst [vmem:[%s109_s5 + $0x10] sm:$0xff] %v132_v2  ;;  %v138_v5 = vld [vmem:[%s115_s4 + $0x48] sm:$0xff]  ;;  %135 = vst [vmem:[%s109_s5 + $0x18] sm:$0xff] %v134_v3  ;;  %v140_v6 = vld [vmem:[%s115_s4 + $0x50] sm:$0xff] }
  0x21   : > { %137 = vst [vmem:[%s109_s5 + $0x20] sm:$0xff] %v136_v4  ;;  %139 = vst [vmem:[%s109_s5 + $0x28] sm:$0xff] %v138_v5  ;;  %v142_v7 = vld [vmem:[%s115_s4 + $0x58] sm:$0xff] }
  0x22   : > { %141 = vst [vmem:[%s109_s5 + $0x30] sm:$0xff] %v140_v6  ;;  %143 = vst [vmem:[%s109_s5 + $0x38] sm:$0xff] %v142_v7 }
  0x23 PF: > { %p350_p11 = scmp.ge.s32.totalorder %s462_s21, 1  ;;  %p148_p12 = scmp.lt.s32.totalorder %s462_s21, 3 }
  0x25   : > { %p149_p13 = pnand %p350_p11, %p148_p12 }
  0x26   : > { %s155_s6 = sand.u32 (!%p149_p13), 1, %s446_s19   ;;  %s193_s8 = sld [smem:[#allocation3]] (!%p149_p13) }
  0x27   : > { %152 = sbr.rel (%p149_p13) target bundleno = 59 (0x3b), region = 43  ;;  %s351_s7 = sshll.u32 (!%p149_p13), %s155_s6, 6 }
  0x28   : > { %s197_s9 = sld [smem:[#allocation4]] (!%p149_p13)  ;;  %s352_s10 = sshll.u32 (!%p149_p13), %s454_s20, 3 }
  0x29   : > { %s357_s11 = sld [smem:[#allocation3 + $0x1]] (!%p149_p13)  ;;  %s157_s12 = scalar_lea.vmem (!%p149_p13), [#allocation5], %s351_s7 }
  0x2a   : > { %s360_s13 = sld [smem:[#allocation3 + $0x2]] (!%p149_p13)  ;;  %p538_p0 = scmp.lt.s32.totalorder (!%p149_p13), %s352_s10, 15 }
  0x2b   : > { %s363_s14 = sld [smem:[#allocation3 + $0x3]] (!%p149_p13) }
  0x2c   : > { %v190_v8 = vld [vmem:[%s157_s12] ss:$4 sm:$0xff]  ;;  %v194_v10 = vstv %s193_s8  ;;  %v355_v13 = vld [vmem:[%s157_s12 + $0x1] ss:$4 sm:$0xff]  ;;  %v358_v16 = vld [vmem:[%s157_s12 + $0x2] ss:$4 sm:$0xff] }
  0x2d   : > { %v354_v9 = vld [vmem:[%s157_s12 + $0x20] ss:$4 sm:$0xff]  ;;  %v195_v11 = vmul.f32 %v194_v10, %v190_v8  ;;  %v356_v14 = vld [vmem:[%s157_s12 + $0x21] ss:$4 sm:$0xff]  ;;  %v359_v17 = vld [vmem:[%s157_s12 + $0x22] ss:$4 sm:$0xff] }
  0x2e   : > { %v196_v12 = vmul.f32 %v354_v9, %v194_v10  ;;  %v198_v15 = vstv %s197_s9  ;;  %v361_v21 = vld [vmem:[%s157_s12 + $0x3] ss:$4 sm:$0xff]  ;;  %s574_s10 = smov (!%p538_p0, %s352_s10), 15 }
  0x2f   : > { %v199_v18 = vadd.f32 %v198_v15, %v195_v11  ;;  %v206_v20 = vstv %s357_s11  ;;  %v362_v22 = vld [vmem:[%s157_s12 + $0x23] ss:$4 sm:$0xff]  ;;  %s353_s16 = sshll.u32 %s574_s10, 1 }
  0x30   : > { %v200_v19 = vadd.f32 %v198_v15, %v196_v12  ;;  %v207_v23 = vmul.f32 %v355_v13, %v206_v20  ;;  %v208_v24 = vmul.f32 %v356_v14, %v206_v20  ;;  %v216_v25 = vstv %s360_s13  ;;  %s188_s19 = scalar_lea.vmem %s565_s3, %s353_s16 }
  0x31   : > { %v217_v26 = vmul.f32 %v358_v16, %v216_v25  ;;  %v218_v27 = vmul.f32 %v359_v17, %v216_v25  ;;  %v226_v28 = vstv %s363_s14 }
  0x32   : > { %v209_v29 = vadd.f32 %v207_v23, %v199_v18  ;;  %v210_v30 = vadd.f32 %v208_v24, %v200_v19  ;;  %v227_v31 = vmul.f32 %v361_v21, %v226_v28  ;;  %v228_v32 = vmul.f32 %v362_v22, %v226_v28 }
  0x34   : > { %v219_v33 = vadd.f32 %v217_v26, %v209_v29  ;;  %v220_v34 = vadd.f32 %v218_v27, %v210_v30 }
  0x36   : > { %v229_v35 = vadd.f32 %v227_v31, %v219_v33  ;;  %v230_v36 = vadd.f32 %v228_v32, %v220_v34 }
  0x38   : > { %v233_v37 = vcombine.low %v229_v35, %v230_v36  ;;  %v234_v38 = vcombine.high %v229_v35, %v230_v36 }
  0x3a   : > { %364 = vst.sshfl [vmem:[%s188_s19] sm:$0xff pattern:$0x75316420] %v233_v37  ;;  %365 = vst.sshfl [vmem:[%s188_s19 + $0x8] sm:$0xff pattern:$0x75316420] %v234_v38 }
  0x3b PF: > { %s20_s21 = sadd.s32 1, %s462_s21   ;;  %s567_s19 = smov %s450_s0 }
  0x3c   : > { %p17_p1 = scmp.ge.s32.totalorder %s20_s21, 4   ;;  %s568_s0 = smov %s526_s25 }
  0x3d   : > { %s569_s20 = smov %s458_s1  ;;  %s570_s1 = smov %s572_s22 }
  0x3e   :  { %19 = sbr.rel (!%p17_p1) target bundleno = 18 (0x12), region = 89 }

</bundles_post_ra>
